<compile_context>
chip_gen: v5e
topology: v5e:2x2
jax: 0.10.0
libtpu: 0.0.40
codegen_flags: <defaults>
</compile_context>

<pallas_src>
import jax
import jax.numpy as jnp
from jax.experimental import pallas as pl
from jax.experimental.pallas import tpu as pltpu


def _round_up(v, m):
    return (v + m - 1) // m * m


def _classifier_kernel(x_ref, w1_ref, w2_ref, w3_ref, params_ref, out_ref):
    eps = jnp.float32(1e-5)
    n = x_ref.shape[0]
    inv_n = jnp.float32(1.0 / n)
    hp = w1_ref.shape[1]           # padded hidden dim
    op = w3_ref.shape[1]           # padded output dim

    # Single packed parameter slab: rows 0..4 = g1, beta1, g2, beta2, b3.
    p = params_ref[...]                                   # (8, P) f32
    g1 = p[0:1, :hp]
    be1 = p[1:2, :hp]
    g2 = p[2:3, :hp]
    be2 = p[3:4, :hp]
    b3 = p[4:5, :op]

    mm_dt = w1_ref.dtype           # f32 here; bf16 on v6e/v7x if desired

    # --- Conv2d(input_dim, hidden_dim, k=1); bias dropped (BN cancels it) ---
    x = x_ref[...].astype(mm_dt)                           # (N, C_in) natural K
    h = jnp.dot(x, w1_ref[...], preferred_element_type=jnp.float32)   # (N, Hp)

    # --- BatchNorm2d(hidden_dim), training mode, fused scale/shift + ReLU ---
    mu = jnp.sum(h, axis=0, keepdims=True) * inv_n         # (1, Hp)
    hc = h - mu
    var = jnp.sum(hc * hc, axis=0, keepdims=True) * inv_n  # biased, centered
    scale = g1 * jax.lax.rsqrt(var + eps)
    h = jnp.maximum(hc * scale + be1, 0.0)

    # --- Conv2d(hidden_dim, hidden_dim, k=1); bias dropped (BN cancels it) --
    h = jnp.dot(h.astype(mm_dt), w2_ref[...],
                preferred_element_type=jnp.float32)

    # --- BatchNorm2d(hidden_dim) + ReLU -------------------------------------
    mu2 = jnp.sum(h, axis=0, keepdims=True) * inv_n
    hc2 = h - mu2
    var2 = jnp.sum(hc2 * hc2, axis=0, keepdims=True) * inv_n
    scale2 = g2 * jax.lax.rsqrt(var2 + eps)
    h = jnp.maximum(hc2 * scale2 + be2, 0.0)

    # --- nnSqueeze is a no-op; Linear (padded cols have bias -1e30) ----------
    z = jnp.dot(h.astype(mm_dt), w3_ref[...],
                preferred_element_type=jnp.float32) + b3    # (N, Op) f32

    # --- log_softmax over dim=1 (kept f32; -1e30 pad vanishes from lse) ------
    zmax = jnp.max(z, axis=-1, keepdims=True)
    zs = z - zmax
    lse = jnp.log(jnp.sum(jnp.exp(zs), axis=-1, keepdims=True))
    out_ref[...] = zs - lse


def prepare_params(params, input_dim, hidden_dim, output_dim,
                   matmul_dtype=jnp.float32):
    """One-time: transpose weights to (in, out), pad hidden/output dims to 128,
    pack the small per-channel rows into a single (8, P) slab."""
    (w1, b1, g1, beta1, w2, b2, g2, beta2, w3, b3) = params
    del b1, b2  # cancelled exactly by training-mode BN mean subtraction
    hp = _round_up(hidden_dim, 128)
    op = _round_up(output_dim, 128)
    pw = max(hp, op)

    # Weights pre-transposed to (in, out); K of the first matmul is NOT padded.
    w1t = jnp.zeros((input_dim, hp), jnp.float32).at[:, :hidden_dim].set(w1.T)
    w2t = jnp.zeros((hp, hp), jnp.float32).at[:hidden_dim, :hidden_dim].set(w2.T)
    w3t = jnp.zeros((hp, op), jnp.float32).at[:hidden_dim, :output_dim].set(w3.T)
    w1t = w1t.astype(matmul_dtype)
    w2t = w2t.astype(matmul_dtype)
    w3t = w3t.astype(matmul_dtype)

    # Packed parameter slab: one DMA instead of five.
    # gamma pad = 0 keeps padded hidden channels at 0; b3 pad = -1e30 forces
    # padded logits out of the log-softmax lse.  Logit path stays f32.
    packed = jnp.zeros((8, pw), jnp.float32)
    packed = packed.at[0, :hidden_dim].set(g1)
    packed = packed.at[1, :hidden_dim].set(beta1)
    packed = packed.at[2, :hidden_dim].set(g2)
    packed = packed.at[3, :hidden_dim].set(beta2)
    packed = packed.at[4, :].set(-1e30)
    packed = packed.at[4, :output_dim].set(b3)

    return (w1t, w2t, w3t, packed), (hp, op)


def classifier_forward(x_nchw, prepped, pad_dims, output_dim):
    """x_nchw: (N, C_in, 1, 1) float32.  Returns (N, output_dim) log-probs."""
    n, c_in, hh, ww = x_nchw.shape
    assert hh == 1 and ww == 1, "nnSqueeze + Linear requires 1x1 spatial dims"
    _, op = pad_dims

    x2d = x_nchw.reshape(n, c_in)   # no feature padding: natural K for matmul 1

    vmem = pl.BlockSpec(memory_space=pltpu.MemorySpace.VMEM)
    out_pad = pl.pallas_call(
        _classifier_kernel,
        out_shape=jax.ShapeDtypeStruct((n, op), jnp.float32),
        in_specs=[vmem] * 5,
        out_specs=vmem,
        # 32 MiB is safe on v5e/v6e (128 MiB) and within v7x's 64 MiB per TC.
        compiler_params=pltpu.CompilerParams(vmem_limit_bytes=32 * 1024 * 1024),
    )(x2d, *prepped)
    return out_pad[:, :output_dim]


def init_params(key, input_dim, hidden_dim, output_dim):
    ks = jax.random.split(key, 6)
    # Conv2d weights are (out, in, 1, 1) in PyTorch -> stored as (out, in).
    w1 = jax.random.normal(ks[0], (hidden_dim, input_dim), jnp.float32) * 0.1
    b1 = jax.random.normal(ks[1], (hidden_dim,), jnp.float32) * 0.1
    g1 = jnp.ones((hidden_dim,), jnp.float32)
    beta1 = jnp.zeros((hidden_dim,), jnp.float32)
    w2 = jax.random.normal(ks[2], (hidden_dim, hidden_dim), jnp.float32) * 0.1
    b2 = jax.random.normal(ks[3], (hidden_dim,), jnp.float32) * 0.1
    g2 = jnp.ones((hidden_dim,), jnp.float32)
    beta2 = jnp.zeros((hidden_dim,), jnp.float32)
    # Linear weight is (out_features, in_features).
    w3 = jax.random.normal(ks[4], (output_dim, hidden_dim), jnp.float32) * 0.1
    b3 = jax.random.normal(ks[5], (output_dim,), jnp.float32) * 0.1
    return (w1, b1, g1, beta1, w2, b2, g2, beta2, w3, b3)


def _reference(x_nchw, params):
    """Pure-JAX reference for correctness checking (matches PyTorch fwd)."""
    (w1, b1, g1, beta1, w2, b2, g2, beta2, w3, b3) = params
    eps = 1e-5
    x = x_nchw.reshape(x_nchw.shape[0], x_nchw.shape[1])

    def bn(h, g, be):
        mu = jnp.mean(h, axis=0, keepdims=True)
        var = jnp.mean((h - mu) ** 2, axis=0, keepdims=True)
        return (h - mu) / jnp.sqrt(var + eps) * g + be

    h = x @ w1.T + b1
    h = jnp.maximum(bn(h, g1, beta1), 0.0)
    h = h @ w2.T + b2
    h = jnp.maximum(bn(h, g2, beta2), 0.0)
    z = h @ w3.T + b3
    return jax.nn.log_softmax(z, axis=1)


if __name__ == "__main__":
    batch, input_dim, hidden_dim, output_dim = 8, 16, 32, 10

    key = jax.random.PRNGKey(0)
    kx, kp = jax.random.split(key)
    x = jax.random.normal(kx, (batch, input_dim, 1, 1), jnp.float32)
    params = init_params(kp, input_dim, hidden_dim, output_dim)
    # TODO(synk): pass matmul_dtype=jnp.bfloat16 on v6e/v7x when a looser
    # tolerance is acceptable (kept f32 here to satisfy the 1e-4 check).
    prepped, pad_dims = prepare_params(params, input_dim, hidden_dim, output_dim,
                                       matmul_dtype=jnp.float32)

    out = classifier_forward(x, prepped, pad_dims, output_dim)
    out = jax.block_until_ready(out)

    ref = _reference(x, params)
    assert out.shape == (batch, output_dim)
    assert jnp.allclose(out, ref, atol=1e-4, rtol=1e-4), "mismatch vs reference"

    print("KERNEL_OK")
</pallas_src>

<mosaic_0001>
module attributes {stable_mosaic.version = 11 : i64} {
  func.func @_classifier_kernel(%arg0: memref<8x16xf32, #tpu.memory_space<vmem>>, %arg1: memref<16x128xf32, #tpu.memory_space<vmem>>, %arg2: memref<128x128xf32, #tpu.memory_space<vmem>>, %arg3: memref<128x128xf32, #tpu.memory_space<vmem>>, %arg4: memref<8x128xf32, #tpu.memory_space<vmem>>, %arg5: memref<8x128xf32, #tpu.memory_space<vmem>>) attributes {dimension_semantics = [], scalar_prefetch = 0 : i64, scratch_operands = 0 : i64, tpu.core_type = #tpu.core_type<tc>} {
    %c0 = arith.constant 0 : index
    %c0_0 = arith.constant 0 : index
    %0 = vector.load %arg4[%c0, %c0_0] : memref<8x128xf32, #tpu.memory_space<vmem>>, vector<8x128xf32>
    %1 = vector.extract_strided_slice %0 {offsets = [0, 0], sizes = [1, 128], strides = [1, 1]} : vector<8x128xf32> to vector<1x128xf32>
    %2 = vector.extract_strided_slice %0 {offsets = [1, 0], sizes = [1, 128], strides = [1, 1]} : vector<8x128xf32> to vector<1x128xf32>
    %3 = vector.extract_strided_slice %0 {offsets = [2, 0], sizes = [1, 128], strides = [1, 1]} : vector<8x128xf32> to vector<1x128xf32>
    %4 = vector.extract_strided_slice %0 {offsets = [3, 0], sizes = [1, 128], strides = [1, 1]} : vector<8x128xf32> to vector<1x128xf32>
    %5 = vector.extract_strided_slice %0 {offsets = [4, 0], sizes = [1, 128], strides = [1, 1]} : vector<8x128xf32> to vector<1x128xf32>
    %c0_1 = arith.constant 0 : index
    %c0_2 = arith.constant 0 : index
    %6 = vector.load %arg0[%c0_1, %c0_2] : memref<8x16xf32, #tpu.memory_space<vmem>>, vector<8x16xf32>
    %c0_3 = arith.constant 0 : index
    %c0_4 = arith.constant 0 : index
    %7 = vector.load %arg1[%c0_3, %c0_4] : memref<16x128xf32, #tpu.memory_space<vmem>>, vector<16x128xf32>
    %cst = arith.constant dense<0.000000e+00> : vector<8x128xf32>
    %8 = tpu.matmul %6, %7, %cst {dimension_numbers = #tpu.dot_dimension_numbers<[1], [0], [0], [1], [0, 0, 1, 1], [], []>} : vector<8x16xf32>, vector<16x128xf32>, vector<8x128xf32> -> vector<8x128xf32>
    %cst_5 = arith.constant dense<0.000000e+00> : vector<128xf32>
    %9 = vector.multi_reduction <add>, %8, %cst_5 [0] : vector<8x128xf32> to vector<128xf32>
    %10 = vector.shape_cast %9 : vector<128xf32> to vector<1x128xf32>
    %cst_6 = arith.constant 1.250000e-01 : f32
    %11 = vector.broadcast %cst_6 : f32 to vector<1x128xf32>
    %12 = arith.mulf %10, %11 : vector<1x128xf32>
    %13 = vector.broadcast %12 : vector<1x128xf32> to vector<8x128xf32>
    %14 = arith.subf %8, %13 : vector<8x128xf32>
    %15 = arith.mulf %14, %14 : vector<8x128xf32>
    %cst_7 = arith.constant dense<0.000000e+00> : vector<128xf32>
    %16 = vector.multi_reduction <add>, %15, %cst_7 [0] : vector<8x128xf32> to vector<128xf32>
    %17 = vector.shape_cast %16 : vector<128xf32> to vector<1x128xf32>
    %cst_8 = arith.constant 1.250000e-01 : f32
    %18 = vector.broadcast %cst_8 : f32 to vector<1x128xf32>
    %19 = arith.mulf %17, %18 : vector<1x128xf32>
    %cst_9 = arith.constant 9.99999974E-6 : f32
    %20 = vector.broadcast %cst_9 : f32 to vector<1x128xf32>
    %21 = arith.addf %19, %20 : vector<1x128xf32>
    %22 = math.rsqrt %21 : vector<1x128xf32>
    %23 = arith.mulf %1, %22 : vector<1x128xf32>
    %24 = vector.broadcast %23 : vector<1x128xf32> to vector<8x128xf32>
    %25 = arith.mulf %14, %24 : vector<8x128xf32>
    %26 = vector.broadcast %2 : vector<1x128xf32> to vector<8x128xf32>
    %27 = arith.addf %25, %26 : vector<8x128xf32>
    %cst_10 = arith.constant 0.000000e+00 : f32
    %28 = vector.broadcast %cst_10 : f32 to vector<8x128xf32>
    %29 = arith.maximumf %27, %28 : vector<8x128xf32>
    %c0_11 = arith.constant 0 : index
    %c0_12 = arith.constant 0 : index
    %30 = vector.load %arg2[%c0_11, %c0_12] : memref<128x128xf32, #tpu.memory_space<vmem>>, vector<128x128xf32>
    %cst_13 = arith.constant dense<0.000000e+00> : vector<8x128xf32>
    %31 = tpu.matmul %29, %30, %cst_13 {dimension_numbers = #tpu.dot_dimension_numbers<[1], [0], [0], [1], [0, 0, 1, 1], [], []>} : vector<8x128xf32>, vector<128x128xf32>, vector<8x128xf32> -> vector<8x128xf32>
    %cst_14 = arith.constant dense<0.000000e+00> : vector<128xf32>
    %32 = vector.multi_reduction <add>, %31, %cst_14 [0] : vector<8x128xf32> to vector<128xf32>
    %33 = vector.shape_cast %32 : vector<128xf32> to vector<1x128xf32>
    %cst_15 = arith.constant 1.250000e-01 : f32
    %34 = vector.broadcast %cst_15 : f32 to vector<1x128xf32>
    %35 = arith.mulf %33, %34 : vector<1x128xf32>
    %36 = vector.broadcast %35 : vector<1x128xf32> to vector<8x128xf32>
    %37 = arith.subf %31, %36 : vector<8x128xf32>
    %38 = arith.mulf %37, %37 : vector<8x128xf32>
    %cst_16 = arith.constant dense<0.000000e+00> : vector<128xf32>
    %39 = vector.multi_reduction <add>, %38, %cst_16 [0] : vector<8x128xf32> to vector<128xf32>
    %40 = vector.shape_cast %39 : vector<128xf32> to vector<1x128xf32>
    %cst_17 = arith.constant 1.250000e-01 : f32
    %41 = vector.broadcast %cst_17 : f32 to vector<1x128xf32>
    %42 = arith.mulf %40, %41 : vector<1x128xf32>
    %cst_18 = arith.constant 9.99999974E-6 : f32
    %43 = vector.broadcast %cst_18 : f32 to vector<1x128xf32>
    %44 = arith.addf %42, %43 : vector<1x128xf32>
    %45 = math.rsqrt %44 : vector<1x128xf32>
    %46 = arith.mulf %3, %45 : vector<1x128xf32>
    %47 = vector.broadcast %46 : vector<1x128xf32> to vector<8x128xf32>
    %48 = arith.mulf %37, %47 : vector<8x128xf32>
    %49 = vector.broadcast %4 : vector<1x128xf32> to vector<8x128xf32>
    %50 = arith.addf %48, %49 : vector<8x128xf32>
    %cst_19 = arith.constant 0.000000e+00 : f32
    %51 = vector.broadcast %cst_19 : f32 to vector<8x128xf32>
    %52 = arith.maximumf %50, %51 : vector<8x128xf32>
    %c0_20 = arith.constant 0 : index
    %c0_21 = arith.constant 0 : index
    %53 = vector.load %arg3[%c0_20, %c0_21] : memref<128x128xf32, #tpu.memory_space<vmem>>, vector<128x128xf32>
    %cst_22 = arith.constant dense<0.000000e+00> : vector<8x128xf32>
    %54 = tpu.matmul %52, %53, %cst_22 {dimension_numbers = #tpu.dot_dimension_numbers<[1], [0], [0], [1], [0, 0, 1, 1], [], []>} : vector<8x128xf32>, vector<128x128xf32>, vector<8x128xf32> -> vector<8x128xf32>
    %55 = vector.broadcast %5 : vector<1x128xf32> to vector<8x128xf32>
    %56 = arith.addf %54, %55 : vector<8x128xf32>
    %cst_23 = arith.constant dense<0xFF800000> : vector<8xf32>
    %57 = vector.multi_reduction <maximumf>, %56, %cst_23 [1] : vector<8x128xf32> to vector<8xf32>
    %58 = vector.shape_cast %57 : vector<8xf32> to vector<8x1xf32>
    %59 = vector.broadcast %58 : vector<8x1xf32> to vector<8x128xf32>
    %60 = arith.subf %56, %59 : vector<8x128xf32>
    %61 = math.exp %60 : vector<8x128xf32>
    %cst_24 = arith.constant dense<0.000000e+00> : vector<8xf32>
    %62 = vector.multi_reduction <add>, %61, %cst_24 [1] : vector<8x128xf32> to vector<8xf32>
    %63 = vector.shape_cast %62 : vector<8xf32> to vector<8x1xf32>
    %64 = math.log %63 : vector<8x1xf32>
    %65 = vector.broadcast %64 : vector<8x1xf32> to vector<8x128xf32>
    %66 = arith.subf %60, %65 : vector<8x128xf32>
    %c0_25 = arith.constant 0 : index
    %c0_26 = arith.constant 0 : index
    %67 = vector.load %arg5[%c0_25, %c0_26] : memref<8x128xf32, #tpu.memory_space<vmem>>, vector<8x128xf32>
    tpu.vector_store %arg5[%c0_25, %c0_26], %66 {strides = array<i32>} : memref<8x128xf32, #tpu.memory_space<vmem>>, vector<8x128xf32>,
    return
  }
}

</mosaic_0001>

<bundles_post_ra>
// kernel: tpu_custom_call.1
= control target key start
LH: loop header
LB: loop body
LE: loop exit
PB: predicated region body
PF: predicated region fallthrough
CT: control target
= control target key end

     0   :  { %10 = vsyncpa [#allocation3], 0  ;;  %s524_s0 = inlined_call_operand.hbm [shape: f32[8,16], index: 0, kind: input, shape index: {}]   ;;  %s525_s1 = inlined_call_operand.hbm [shape: f32[16,128], index: 1, kind: input, shape index: {}]   ;;  %s526_s2 = inlined_call_operand.hbm [shape: f32[128,128], index: 2, kind: input, shape index: {}]   ;;  %s527_s3 = inlined_call_operand.hbm [shape: f32[128,128], index: 3, kind: input, shape index: {}]   ;;  %s528_s4 = inlined_call_operand.hbm [shape: f32[8,128], index: 4, kind: input, shape index: {}]   ;;  %s529_s5 = inlined_call_operand.hbm [shape: f32[8,128], index: 5, kind: output, shape index: {}]  }
   0x1   :  { %11 = vsyncpa [#allocation6], 0 }
   0x2   :  { %12 = vsyncpa [#allocation9], 0  ;;  %s29_s20 = sshll.u32 %s525_s1, 4  ;;  %s30_s20 = int_to_ptr.hbm [resolvable:$true] %s29_s20 }
   0x3   :  { %13 = vsyncpa [#allocation4], 0  ;;  %s461_s21 = smov [#allocation5]   ;;  %s55_s25 = sshll.u32 %s527_s3, 4  ;;  %s56_s25 = int_to_ptr.hbm [resolvable:$true] %s55_s25 }
   0x4   :  { %s31_s22 = sshll.u32 %s461_s21, 4  ;;  %s462_s26 = smov 128   ;;  %s32_s22 = int_to_ptr.vmem [resolvable:$true] %s31_s22 }
   0x5   :  { %s463_s27 = smov 8   ;;  %s464_s28 = smov [#allocation8]  }
   0x6   :  { %37 = dma.hbm_to_vmem [thread:$0]  %s30_s20, 256, %s32_s22, [#allocation6], %s462_s26, %s462_s26, %s463_s27  }
   0x7   :  { %s57_s29 = sshll.u32 %s464_s28, 4  ;;  %s19_s7 = sshll.u32 %s524_s0, 4  ;;  %s58_s29 = int_to_ptr.vmem [resolvable:$true] %s57_s29  ;;  %s20_s7 = int_to_ptr.hbm [resolvable:$true] %s19_s7 }
   0x8   :  { %63 = dma.hbm_to_vmem [thread:$0]  %s56_s25, 2048, %s58_s29, [#allocation9], %s462_s26, %s462_s26, %s463_s27  }
   0x9   :  { %s42_s9 = sshll.u32 %s526_s2, 4  ;;  %s465_s10 = smov [#allocation2]   ;;  %s43_s9 = int_to_ptr.hbm [resolvable:$true] %s42_s9 }
   0xa   :  { %s21_s11 = sshll.u32 %s465_s10, 4  ;;  %s466_s3 = smov [#allocation7]   ;;  %s22_s11 = int_to_ptr.vmem [resolvable:$true] %s21_s11 }
   0xb   :  { %24 = dma.hbm_to_vmem [thread:$0]  %s20_s7, 128, %s22_s11, [#allocation3]  }
   0xc   :  { %s44_s12 = sshll.u32 %s466_s3, 4  ;;  %s69_s15 = sshll.u32 %s528_s4, 4  ;;  %s45_s12 = int_to_ptr.vmem [resolvable:$true] %s44_s12  ;;  %s70_s15 = int_to_ptr.hbm [resolvable:$true] %s69_s15 }
   0xd   :  { %50 = dma.hbm_to_vmem [thread:$0]  %s43_s9, 2048, %s45_s12, [#allocation6], %s462_s26, %s462_s26, %s463_s27  }
   0xe   :  { %s467_s0 = smov [#allocation10]  }
   0xf   :  { %s71_s16 = sshll.u32 %s467_s0, 4  ;;  %s72_s16 = int_to_ptr.vmem [resolvable:$true] %s71_s16 }
  0x10   :  { %74 = dma.hbm_to_vmem [thread:$0]  %s70_s15, 128, %s72_s16, [#allocation9]  }
  0x11   :  { %453 = dma.done.wait [#allocation3], 128  }
  0x12   :  { %454 = vsyncadd [#allocation3], 4294967168 }
  0x13   :  { %455 = dma.done.wait [#allocation6], 2304  }
  0x14   :  { %456 = vsyncadd [#allocation6], 4294964992 }
  0x15   :  { %457 = dma.done.wait [#allocation9], 2176  }
  0x16   :  { %458 = vsyncadd [#allocation9], 4294965120  ;;  %v98_v0 = vld [vmem:[#allocation5 + $0x8] sm:$0xff]  ;;  %v97_v1 = vld [vmem:[#allocation5] sm:$0xff]  ;;  %vm99_vm0 = vcmask 130048   ;;  %s468_s2 = smov [#allocation11]  }
  0x17   :  { %117 = vmatpush.msra.mxu0 %v98_v0  ;;  %v96_v2 = vld [vmem:[#allocation2] sm:$0xff]  ;;  %v171_v3 = vld [vmem:[#allocation7 + $0x78] sm:$0xff]  ;;  %v170_v6 = vld [vmem:[#allocation7 + $0x70] sm:$0xff]  ;;  %s278_s4 = sshll.u32 %s468_s2, 4  ;;  %s280_s19 = sshll.u32 %s529_s5, 4  ;;  %s279_s4 = int_to_ptr.vmem [resolvable:$true] %s278_s4  ;;  %s281_s19 = int_to_ptr.hbm [resolvable:$true] %s280_s19 }
  0x18   :  { %172 = vmatpush.msra.mxu1 %v171_v3  ;;  %v169_v8 = vld [vmem:[#allocation7 + $0x68] sm:$0xff]  ;;  %v168_v10 = vld [vmem:[#allocation7 + $0x60] sm:$0xff]  ;;  %v167_v12 = vld [vmem:[#allocation7 + $0x58] sm:$0xff] }
  0x19   :  { %118 = vmatpush.msra.mxu0 %v97_v1  ;;  %v166_v14 = vld [vmem:[#allocation7 + $0x50] sm:$0xff]  ;;  %v165_v16 = vld [vmem:[#allocation7 + $0x48] sm:$0xff]  ;;  %v164_v18 = vld [vmem:[#allocation7 + $0x40] sm:$0xff] }
  0x1a   :  { %292 = vmatmul.msk.f32.vlgmr.msra.gmra.mxu0 %vm99_vm0, %v96_v2  ;;  %173 = vmatpush.msra.mxu1 %v170_v6  ;;  %v163_v20 = vld [vmem:[#allocation7 + $0x38] sm:$0xff]  ;;  %v162_v22 = vld [vmem:[#allocation7 + $0x30] sm:$0xff]  ;;  %v161_v24 = vld [vmem:[#allocation7 + $0x28] sm:$0xff] }
  0x1b   :  { %v160_v26 = vld [vmem:[#allocation7 + $0x20] sm:$0xff]  ;;  %v159_v28 = vld [vmem:[#allocation7 + $0x18] sm:$0xff]  ;;  %v158_v30 = vld [vmem:[#allocation7 + $0x10] sm:$0xff] }
  0x1c   :  { %174 = vmatpush.msra.mxu1 %v169_v8  ;;  %v157_v31 = vld [vmem:[#allocation7 + $0x8] sm:$0xff]  ;;  %v156_v33 = vld [vmem:[#allocation7] sm:$0xff]  ;;  %v240_v51 = vld [vmem:[#allocation8 + $0x78] sm:$0xff] }
  0x1d   :  { %v514_v42 = vld [vmem:[#allocation10] sm:$0xff]  ;;  %242 = vmatpush.msra.mxu2 %v240_v51  ;;  %v239_v54 = vld [vmem:[#allocation8 + $0x70] sm:$0xff]  ;;  %v238_v56 = vld [vmem:[#allocation8 + $0x68] sm:$0xff] }
  0x1e   :  { %175 = vmatpush.msra.mxu1 %v168_v10  ;;  %v153_v47 = vperm.slane %v514_v42, 1  ;;  %v237_v58 = vld [vmem:[#allocation8 + $0x60] sm:$0xff]  ;;  %v236_v60 = vld [vmem:[#allocation8 + $0x58] sm:$0xff]  ;;  %v235_v62 = vld [vmem:[#allocation8 + $0x50] sm:$0xff] }
  0x1f   :  { %243 = vmatpush.msra.mxu2 %v239_v54  ;;  %v234_v0 = vld [vmem:[#allocation8 + $0x48] sm:$0xff]  ;;  %v233_v2 = vld [vmem:[#allocation8 + $0x40] sm:$0xff]  ;;  %v231_v6 = vld [vmem:[#allocation8 + $0x30] sm:$0xff] }
  0x20   :  { %176 = vmatpush.msra.mxu1 %v167_v12  ;;  %v230_v8 = vld [vmem:[#allocation8 + $0x28] sm:$0xff]  ;;  %v229_v10 = vld [vmem:[#allocation8 + $0x20] sm:$0xff]  ;;  %v228_v12 = vld [vmem:[#allocation8 + $0x18] sm:$0xff] }
  0x21   :  { %244 = vmatpush.msra.mxu2 %v238_v56 }
  0x22   :  { %177 = vmatpush.msra.mxu1 %v166_v14  ;;  %v227_v14 = vld [vmem:[#allocation8 + $0x10] sm:$0xff] }
  0x23   :  { %245 = vmatpush.msra.mxu2 %v237_v58 }
  0x24   :  { %178 = vmatpush.msra.mxu1 %v165_v16 }
  0x25   :  { %246 = vmatpush.msra.mxu2 %v236_v60 }
  0x26   :  { %179 = vmatpush.msra.mxu1 %v164_v18 }
  0x27   :  { %247 = vmatpush.msra.mxu2 %v235_v62 }
  0x28   :  { %180 = vmatpush.msra.mxu1 %v163_v20 }
  0x29   :  { %248 = vmatpush.msra.mxu2 %v234_v0 }
  0x2a   :  { %181 = vmatpush.msra.mxu1 %v162_v22 }
  0x2b   :  { %249 = vmatpush.msra.mxu2 %v233_v2 }
  0x2c   :  { %182 = vmatpush.msra.mxu1 %v161_v24 }
  0x2e   :  { %183 = vmatpush.msra.mxu1 %v160_v26 }
  0x30   :  { %184 = vmatpush.msra.mxu1 %v159_v28 }
  0x32   :  { %185 = vmatpush.msra.mxu1 %v158_v30  ;;  %v222_v30 = vperm.slane %v514_v42, 3 }
  0x34   :  { %186 = vmatpush.msra.mxu1 %v157_v31 }
  0x36   :  { %187 = vmatpush.msra.mxu1 %v156_v33 }
  0x97   :  { %v120_v4 = vpop.f32.mrf.mxu0 }
  0x98   :  { %v123_v5 = vrot.slane %v120_v4, 4 }
  0x9a   :  { %v124_v7 = vadd.f32 %v123_v5, %v120_v4 }
  0x9c   :  { %v125_v9 = vrot.slane %v124_v7, 2 }
  0x9e   :  { %v126_v11 = vadd.f32 %v125_v9, %v124_v7 }
  0xa0   :  { %v127_v13 = vrot.slane %v126_v11, 1 }
  0xa2   :  { %v128_v15 = vadd.f32 %v127_v13, %v126_v11 }
  0xa4   :  { %v129_v17 = vmul.f32 0.125, %v128_v15  ;;  %v226_v15 = vld [vmem:[#allocation8 + $0x8] sm:$0xff] }
  0xa6   :  { %v130_v19 = vsub.f32 %v120_v4, %v129_v17  ;;  %v232_v4 = vld [vmem:[#allocation8 + $0x38] sm:$0xff]  ;;  %v225_v17 = vld [vmem:[#allocation8] sm:$0xff] }
  0xa7   :  { %250 = vmatpush.msra.mxu2 %v232_v4 }
  0xa8   :  { %v131_v21 = vmul.f32 %v130_v19, %v130_v19 }
  0xa9   :  { %251 = vmatpush.msra.mxu2 %v231_v6 }
  0xaa   :  { %v132_v23 = vrot.slane %v131_v21, 4 }
  0xab   :  { %252 = vmatpush.msra.mxu2 %v230_v8 }
  0xac   :  { %v133_v25 = vadd.f32 %v132_v23, %v131_v21 }
  0xad   :  { %253 = vmatpush.msra.mxu2 %v229_v10 }
  0xae   :  { %v134_v27 = vrot.slane %v133_v25, 2 }
  0xaf   :  { %254 = vmatpush.msra.mxu2 %v228_v12 }
  0xb0   :  { %v135_v29 = vadd.f32 %v134_v27, %v133_v25 }
  0xb1   :  { %255 = vmatpush.msra.mxu2 %v227_v14 }
  0xb2   :  { %v136_v32 = vrot.slane %v135_v29, 1 }
  0xb3   :  { %256 = vmatpush.msra.mxu2 %v226_v15 }
  0xb4   :  { %v137_v34 = vadd.f32 %v136_v32, %v135_v29 }
  0xb5   :  { %257 = vmatpush.msra.mxu2 %v225_v17 }
  0xb6   :  { %v138_v35 = vmul.f32 0.125, %v137_v34  ;;  %v241_v34 = vperm.slane %v514_v42, 4 }
  0xb8   :  { %v139_v36 = vadd.f32 1e-05, %v138_v35 }
  0xba   :  { %301 = vrsqrt.f32 %v139_v36  ;;  %vm146_vm2 = vweird.f32 %v139_v36 }
  0xc0   :  { %v302_v37 = vpop.eup %301 }
  0xc1   :  { %v141_v38 = vmul.f32 %v302_v37, %v139_v36  ;;  %vm147_vm1 = vweird.f32 %v302_v37 }
  0xc2   :  { %vm148_vm3 = vmor %vm146_vm2, %vm147_vm1 }
  0xc3   :  { %v142_v39 = vmul.f32 %v302_v37, %v141_v38 }
  0xc5   :  { %v143_v40 = vmul.f32 0.5, %v142_v39 }
  0xc7   :  { %v144_v41 = vsub.f32 1.5, %v143_v40 }
  0xc9   :  { %v145_v43 = vmul.f32 %v302_v37, %v144_v41 }
  0xcb   :  { %v149_v44 = vsel %vm148_vm3, %v302_v37, %v145_v43 }
  0xcc   :  { %v150_v45 = vmul.f32 %v149_v44, %v514_v42 }
  0xce   :  { %v151_v46 = vperm.slane %v150_v45, 0 }
  0xd0   :  { %v152_v48 = vmul.f32 %v151_v46, %v130_v19 }
  0xd2   :  { %v154_v49 = vadd.f32 %v153_v47, %v152_v48 }
  0xd4   :  { %v155_v50 = vmax.f32 %v154_v49, 0.0 }
  0xd6   :  { %188 = vmatmul.f32.vlgmr.msra.gmra.mxu1 %v155_v50 }
 0x153   :  { %v189_v52 = vpop.f32.mrf.mxu1 }
 0x154   :  { %v192_v53 = vrot.slane %v189_v52, 4 }
 0x156   :  { %v193_v55 = vadd.f32 %v192_v53, %v189_v52 }
 0x158   :  { %v194_v57 = vrot.slane %v193_v55, 2 }
 0x15a   :  { %v195_v59 = vadd.f32 %v194_v57, %v193_v55 }
 0x15c   :  { %v196_v61 = vrot.slane %v195_v59, 1 }
 0x15e   :  { %v197_v63 = vadd.f32 %v196_v61, %v195_v59 }
 0x160   :  { %v198_v1 = vmul.f32 0.125, %v197_v63 }
 0x162   :  { %v199_v3 = vsub.f32 %v189_v52, %v198_v1 }
 0x164   :  { %v200_v5 = vmul.f32 %v199_v3, %v199_v3 }
 0x166   :  { %v201_v7 = vrot.slane %v200_v5, 4 }
 0x168   :  { %v202_v9 = vadd.f32 %v201_v7, %v200_v5 }
 0x16a   :  { %v203_v11 = vrot.slane %v202_v9, 2 }
 0x16c   :  { %v204_v13 = vadd.f32 %v203_v11, %v202_v9 }
 0x16e   :  { %v205_v16 = vrot.slane %v204_v13, 1 }
 0x170   :  { %v206_v18 = vadd.f32 %v205_v16, %v204_v13 }
 0x172   :  { %v207_v19 = vmul.f32 0.125, %v206_v18 }
 0x174   :  { %v208_v20 = vadd.f32 1e-05, %v207_v19 }
 0x176   :  { %303 = vrsqrt.f32 %v208_v20  ;;  %vm215_vm5 = vweird.f32 %v208_v20 }
 0x17c   :  { %v304_v21 = vpop.eup %303 }
 0x17d   :  { %v210_v22 = vmul.f32 %v304_v21, %v208_v20  ;;  %vm216_vm4 = vweird.f32 %v304_v21 }
 0x17e   :  { %vm217_vm6 = vmor %vm215_vm5, %vm216_vm4 }
 0x17f   :  { %v211_v23 = vmul.f32 %v304_v21, %v210_v22 }
 0x181   :  { %v212_v24 = vmul.f32 0.5, %v211_v23 }
 0x183   :  { %v213_v25 = vsub.f32 1.5, %v212_v24 }
 0x185   :  { %v214_v26 = vmul.f32 %v304_v21, %v213_v25 }
 0x187   :  { %v218_v27 = vsel %vm217_vm6, %v304_v21, %v214_v26 }
 0x188   :  { %v219_v28 = vmul.f32 %v218_v27, %v514_v42 }
 0x18a   :  { %v220_v29 = vperm.slane %v219_v28, 2 }
 0x18c   :  { %v221_v31 = vmul.f32 %v220_v29, %v199_v3 }
 0x18e   :  { %v223_v32 = vadd.f32 %v222_v30, %v221_v31 }
 0x190   :  { %v224_v33 = vmax.f32 %v223_v32, 0.0 }
 0x192   :  { %258 = vmatmul.f32.vlgmr.msra.gmra.mxu2 %v224_v33 }
 0x215   :  { %v259_v35 = vpop.f32.mrf.mxu2 }
 0x216   :  { %v260_v36 = vadd.f32 %v259_v35, %v241_v34 }
 0x218   :  { %262 = vmax.xlane.f32.xlu0 %v260_v36 }
 0x28b   :  { %v263_v37 = vpop.xlane.xlu0 %262 }
 0x28c   :  { %v264_v38 = vsub.f32 %v260_v36, %v263_v37 }
 0x28e   :  { %v265_v39 = vmul.f32 1.442695, %v264_v38 }
 0x290   :  { %305 = vpow2.f32 %v265_v39 }
 0x296   :  { %v306_v40 = vpop.eup %305 }
 0x297   :  { %267 = vadd.xlane.f32.xlu0 %v306_v40 }
 0x30a   :  { %v268_v41 = vpop.xlane.xlu0 %267 }
 0x30b   :  { %307 = vlog2.f32 %v268_v41 }
 0x311   :  { %v308_v43 = vpop.eup %307 }
 0x312   :  { %v270_v44 = vmul.f32 0.6931472, %v308_v43 }
 0x314   :  { %v271_v42 = vsub.f32 %v264_v38, %v270_v44 }
 0x316   :  { %272 = vst [vmem:[#allocation11] sm:$0xff] %v271_v42 }
 0x317   :  { %283 = dma.vmem_to_hbm [thread:$0]  %s279_s4, 128, %s281_s19, [#allocation4]  }
 0x318   :  { %459 = dma.done.wait [#allocation4], 128  }
 0x319   :  { %460 = vsyncadd [#allocation4], 4294967168 }
 0x31a   :  { %288 = vsyncpa [#allocation3], 1 }
 0x31b   :  { %289 = vsyncpa [#allocation6], 1 }
 0x31c   :  { %290 = vsyncpa [#allocation9], 1 }
 0x31d   :  { %291 = vsyncpa [#allocation4], 1 }

</bundles_post_ra>
